<compile_context>
chip_gen: v7x
topology: tpu7x:2x2x1
jax: 0.10.0
libtpu: 0.0.40
codegen_flags: <defaults>
</compile_context>

<pallas_src>
import functools
import math

import jax
import jax.numpy as jnp
from jax.experimental import pallas as pl
from jax.experimental.pallas import tpu as pltpu

EMBED_DIM = 32
NUM_HEADS = 2
VOCAB_SIZE = 50
MEM_SIZE = 20
MEM_PAD = 24                      # memory slots padded to a sublane multiple (>= MEM_SIZE)
OUT_W = 128                       # lane-dense packed-output width
ENT_COL = VOCAB_SIZE              # col 50 of the packed output = attention entropy
EMB_COL = OUT_W - EMBED_DIM       # cols [96,128) of the packed output = token embeddings
LN_EPS = 1e-5                     # nn.LayerNorm default
ENT_EPS = 1e-10                   # entropy epsilon from the PyTorch module
NEG_INF = -1e30

# --- weight-slab row layout (every block starts on a sublane (x8) boundary) ---
VOCAB_PAD = 56                    # 50 vocab rows padded to a multiple of 8
R_EMB = 0                                   # (VOCAB_PAD, 128) packed embedding table
R_QKV = R_EMB + VOCAB_PAD                   # (E, 128): [0,96) = fused Wq*scale|Wk|Wv (transposed)
R_WO = R_QKV + EMBED_DIM                    # (E, 128): [0,32) = out_proj.weight.T
R_W1 = R_WO + EMBED_DIM                     # (E, 128): ff Linear(E,4E).weight.T
R_W2 = R_W1 + EMBED_DIM                     # (4E, 128): [0,32) = ff Linear(4E,E).weight.T
R_WOUT = R_W2 + 4 * EMBED_DIM               # (E, 128): [0,50) = out Linear.weight.T
W_ROWS = R_WOUT + EMBED_DIM                 # 312

# --- bias-slab row layout ---
B_QKV, B_BO, B_LN1G, B_LN1B, B_B1, B_B2, B_LN2G, B_LN2B, B_BOUT, B_ENTSEL, B_EMBSEL = range(11)
B_ROWS = 16


def _xl_kernel(mlen_ref,                       # scalar prefetch (SMEM): true #valid memory rows
               tok_ref, mem_ref, w_ref, b_ref,  # VMEM inputs
               out_ref):                        # (S, 128) packed output slab
    S = tok_ref.shape[0]
    E = EMBED_DIM
    hd = E // NUM_HEADS
    L = MEM_PAD + S
    mem_len = mlen_ref[0]

    # --- bias / constant slab (one tiny load, static slices) ---
    b = b_ref[...]                              # (16, 128)
    bqkv = b[B_QKV:B_QKV + 1, :]                # (1,128) zeros beyond col 96
    bo = b[B_BO:B_BO + 1, :E]
    ln1g = b[B_LN1G:B_LN1G + 1, :E]
    ln1b = b[B_LN1B:B_LN1B + 1, :E]
    b1 = b[B_B1:B_B1 + 1, :]
    b2 = b[B_B2:B_B2 + 1, :E]
    ln2g = b[B_LN2G:B_LN2G + 1, :E]
    ln2b = b[B_LN2B:B_LN2B + 1, :E]
    bout = b[B_BOUT:B_BOUT + 1, :]
    ent_sel = b[B_ENTSEL:B_ENTSEL + 1, :]       # 1.0 at col 50, else 0
    emb_sel = b[B_EMBSEL:B_EMBSEL + 1, :]       # 1.0 at cols [96,128), else 0

    # --- embedding gather: ONE one-hot matmul against the packed (V,128) table
    #     lanes [0,32) = compute copy, lanes [96,128) = output-slab copy ---
    tok = tok_ref[...]                                        # (S, 1) int32
    viota = jax.lax.broadcasted_iota(jnp.int32, (S, VOCAB_PAD), 1)
    onehot = (viota == tok).astype(jnp.float32)               # (S, VOCAB_PAD)
    emb_all = jnp.dot(onehot, w_ref[R_EMB:R_EMB + VOCAB_PAD, :],
                      preferred_element_type=jnp.float32)     # (S, 128)
    x = emb_all[:, :E]                                        # (S, E)

    # --- static-shaped K/V stream: [padded memory ; current segment] ---
    kv = jnp.concatenate([mem_ref[...], x], axis=0)           # (L, E)

    # --- fused Q/K/V projection (q-scale folded into weights/bias at init) ---
    qkvp = jnp.dot(kv, w_ref[R_QKV:R_QKV + E, :],
                   preferred_element_type=jnp.float32) + bqkv  # (L, 128)
    q = qkvp[MEM_PAD:, :E]                                    # (S, E)  (x rows only)
    k = qkvp[:, E:2 * E]                                      # (L, E)
    v = qkvp[:, 2 * E:3 * E]                                  # (L, E)
    k_t = k.T                                                 # (E, L) -- one transpose, shared by heads

    # --- additive key-padding mask, built once ---
    col = jax.lax.broadcasted_iota(jnp.int32, (S, L), 1)
    valid = (col < mem_len) | (col >= MEM_PAD)
    mask_bias = jnp.where(valid, 0.0, NEG_INF)                # (S, L)

    # --- 2-head attention; Wo folded per head (no lane concat of head outputs) ---
    aw_sum = jnp.zeros((S, L), jnp.float32)
    attn128 = jnp.zeros((S, OUT_W), jnp.float32)
    for h in range(NUM_HEADS):
        qh = q[:, h * hd:(h + 1) * hd]
        kh_t = k_t[h * hd:(h + 1) * hd, :]
        vh = v[:, h * hd:(h + 1) * hd]
        s = jnp.dot(qh, kh_t, preferred_element_type=jnp.float32) + mask_bias
        s = s - jnp.max(s, axis=-1, keepdims=True)
        p = jnp.exp(s)
        p = p / jnp.sum(p, axis=-1, keepdims=True)            # exact softmax (top-k depends on it)
        aw_sum = aw_sum + p
        ctx = jnp.dot(p, vh, preferred_element_type=jnp.float32)          # (S, hd)
        attn128 = attn128 + jnp.dot(ctx, w_ref[R_WO + h * hd:R_WO + (h + 1) * hd, :],
                                    preferred_element_type=jnp.float32)   # (S, 128), cols [0,32) live
    attn_out = attn128[:, :E] + bo

    # attention-weight entropy per query (mean over heads); masked cols give 0
    aw = aw_sum * (1.0 / NUM_HEADS)
    ent = -jnp.sum(aw * jnp.log(aw + ENT_EPS), axis=-1, keepdims=True)    # (S, 1)

    def layer_norm(t, g, beta):
        mu = jnp.mean(t, axis=-1, keepdims=True)
        var = jnp.mean(jnp.square(t - mu), axis=-1, keepdims=True)
        return (t - mu) * jax.lax.rsqrt(var + LN_EPS) * g + beta

    x2 = layer_norm(x + attn_out, ln1g, ln1b)

    # feed-forward: Linear(E,4E) -> ReLU -> Linear(4E,E)
    h1 = jnp.maximum(jnp.dot(x2, w_ref[R_W1:R_W1 + E, :],
                             preferred_element_type=jnp.float32) + b1, 0.0)   # (S, 128)
    ffo = jnp.dot(h1, w_ref[R_W2:R_W2 + 4 * E, :],
                  preferred_element_type=jnp.float32)[:, :E] + b2
    out = layer_norm(x2 + ffo, ln2g, ln2b)

    # --- single lane-dense (S, 128) output slab:
    #     cols [0,50) logits, col 50 entropy, cols [96,128) token embeddings ---
    packed = (jnp.dot(out, w_ref[R_WOUT:R_WOUT + E, :],
                      preferred_element_type=jnp.float32) + bout
              + emb_all * emb_sel          # embedding copy already sits in lanes [96,128)
              + ent * ent_sel)             # entropy into col 50 (precomputed one-hot lane)
    out_ref[...] = packed


@functools.partial(jax.jit, static_argnames=("compress",))
def _step(params, tokens, mem_x_pad, mem_ent_pad, mem_len, *, compress):
    """One fused step: Pallas forward + memory append / top-k compression."""
    S = tokens.shape[1]
    tok2d = tokens.reshape(S, 1).astype(jnp.int32)
    mem_len_i = jnp.asarray(mem_len, jnp.int32)
    mlen_arr = mem_len_i.reshape(1)

    in_specs = [
        pl.BlockSpec((S, 1), lambda i, m: (0, 0)),                   # tokens
        pl.BlockSpec((MEM_PAD, EMBED_DIM), lambda i, m: (0, 0)),     # padded memory
        pl.BlockSpec((W_ROWS, OUT_W), lambda i, m: (0, 0)),          # packed weight slab
        pl.BlockSpec((B_ROWS, OUT_W), lambda i, m: (0, 0)),          # packed bias slab
    ]
    # TODO(synk): v7x has 2 TensorCores; a second independent sequence could be run on a
    # leading "parallel" grid axis, but the module's memory semantics force batch=1 here.
    slab = pl.pallas_call(
        _xl_kernel,
        grid_spec=pltpu.PrefetchScalarGridSpec(
            num_scalar_prefetch=1,
            grid=(1,),
            in_specs=in_specs,
            out_specs=pl.BlockSpec((S, OUT_W), lambda i, m: (0, 0))),
        out_shape=jax.ShapeDtypeStruct((S, OUT_W), jnp.float32),
        compiler_params=pltpu.CompilerParams(dimension_semantics=("arbitrary",)),
    )(mlen_arr, tok2d, mem_x_pad, params["w_slab"], params["b_slab"])

    logits = slab[:, :VOCAB_SIZE][None]                       # (1, S, V)
    ent = slab[:, ENT_COL]                                    # (S,)
    x_det = slab[:, EMB_COL:EMB_COL + EMBED_DIM]              # (S, E) detached embeddings

    if compress:
        # append then keep the top MEM_SIZE entries by entropy (fixed shapes throughout)
        cat_x = jnp.concatenate([mem_x_pad, x_det], axis=0)   # (MEM_PAD+S, E)
        cat_e = jnp.concatenate([mem_ent_pad, ent], axis=0)   # (MEM_PAD+S,)
        row = jnp.arange(MEM_PAD + S)
        valid = (row < mem_len_i) | (row >= MEM_PAD)
        masked = jnp.where(valid, cat_e, -1.0)                # valid entropies >= ~0 > -1
        total = jnp.sum(jnp.where(valid, cat_e, 0.0)) + ENT_EPS
        vals, idx = jax.lax.top_k(masked, MEM_SIZE)
        ratio = jnp.sum(vals) / total
        new_x = jnp.zeros((MEM_PAD, EMBED_DIM), jnp.float32).at[:MEM_SIZE].set(cat_x[idx])
        new_e = jnp.zeros((MEM_PAD,), jnp.float32).at[:MEM_SIZE].set(vals)
    else:
        new_x = jax.lax.dynamic_update_slice(mem_x_pad, x_det, (mem_len_i, jnp.int32(0)))
        new_e = jax.lax.dynamic_update_slice(mem_ent_pad, ent, (mem_len_i,))
        ratio = jnp.float32(1.0)
    return logits, new_x, new_e, ratio


def init_params(key):
    E, V = EMBED_DIM, VOCAB_SIZE
    hd = E // NUM_HEADS
    scale = 1.0 / math.sqrt(hd)
    ks = jax.random.split(key, 10)

    def nrm(k, shape, s):
        return jax.random.normal(k, shape, jnp.float32) * s

    embed = nrm(ks[0], (V, E), 1.0)                 # nn.Embedding(V, E)
    in_proj_w = nrm(ks[1], (3 * E, E), 0.02)        # MHA in_proj_weight
    in_proj_b = nrm(ks[2], (3 * E,), 0.01)          # MHA in_proj_bias
    out_proj_w = nrm(ks[3], (E, E), 0.02)           # MHA out_proj.weight
    out_proj_b = nrm(ks[4], (E,), 0.01)
    w1 = nrm(ks[5], (4 * E, E), 0.02)               # ff Linear(E, 4E)
    b1 = nrm(ks[6], (4 * E,), 0.01)
    w2 = nrm(ks[7], (E, 4 * E), 0.02)               # ff Linear(4E, E)
    b2 = nrm(ks[8], (E,), 0.01)
    wout = nrm(ks[9], (V, E), 0.02)                 # out Linear(E, V)
    bout = jnp.zeros((V,), jnp.float32)

    wq, wk, wv = in_proj_w[:E], in_proj_w[E:2 * E], in_proj_w[2 * E:]
    bq, bk, bv = in_proj_b[:E], in_proj_b[E:2 * E], in_proj_b[2 * E:]

    # --- packed weight slab (W_ROWS, 128) ---
    w_slab = jnp.zeros((W_ROWS, OUT_W), jnp.float32)
    w_slab = w_slab.at[R_EMB:R_EMB + V, :E].set(embed)                       # compute copy
    w_slab = w_slab.at[R_EMB:R_EMB + V, EMB_COL:EMB_COL + E].set(embed)      # output-slab copy
    w_slab = w_slab.at[R_QKV:R_QKV + E, :E].set(wq.T * scale)                # q-scale folded
    w_slab = w_slab.at[R_QKV:R_QKV + E, E:2 * E].set(wk.T)
    w_slab = w_slab.at[R_QKV:R_QKV + E, 2 * E:3 * E].set(wv.T)
    w_slab = w_slab.at[R_WO:R_WO + E, :E].set(out_proj_w.T)
    w_slab = w_slab.at[R_W1:R_W1 + E, :4 * E].set(w1.T)
    w_slab = w_slab.at[R_W2:R_W2 + 4 * E, :E].set(w2.T)
    w_slab = w_slab.at[R_WOUT:R_WOUT + E, :V].set(wout.T)

    # --- packed bias / constant slab (B_ROWS, 128) ---
    b_slab = jnp.zeros((B_ROWS, OUT_W), jnp.float32)
    b_slab = b_slab.at[B_QKV, :E].set(bq * scale)
    b_slab = b_slab.at[B_QKV, E:2 * E].set(bk)
    b_slab = b_slab.at[B_QKV, 2 * E:3 * E].set(bv)
    b_slab = b_slab.at[B_BO, :E].set(out_proj_b)
    b_slab = b_slab.at[B_LN1G, :E].set(1.0)
    # B_LN1B stays zero
    b_slab = b_slab.at[B_B1, :4 * E].set(b1)
    b_slab = b_slab.at[B_B2, :E].set(b2)
    b_slab = b_slab.at[B_LN2G, :E].set(1.0)
    # B_LN2B stays zero
    b_slab = b_slab.at[B_BOUT, :V].set(bout)
    b_slab = b_slab.at[B_ENTSEL, ENT_COL].set(1.0)
    b_slab = b_slab.at[B_EMBSEL, EMB_COL:].set(1.0)

    return dict(w_slab=w_slab, b_slab=b_slab)


def init_memory():
    """Empty memory state: fixed-shape padded buffers + Python-tracked length."""
    return (jnp.zeros((MEM_PAD, EMBED_DIM), jnp.float32),
            jnp.zeros((MEM_PAD,), jnp.float32),
            0)


def make_memory_state(mem_x, mem_ent):
    """Pack variable-length memory into the fixed-shape padded state."""
    n = int(mem_x.shape[0])
    assert n <= MEM_PAD
    x_pad = jnp.zeros((MEM_PAD, EMBED_DIM), jnp.float32).at[:n].set(mem_x)
    e_pad = jnp.zeros((MEM_PAD,), jnp.float32).at[:n].set(mem_ent)
    return (x_pad, e_pad, n)


def memory_view(state):
    """Variable-length view of the padded memory state (for inspection only)."""
    x_pad, e_pad, n = state
    return x_pad[:n], e_pad[:n]


def transformer_xl_forward(params, tokens, mem_state=None):
    """tokens: (1, S) int32 (batch must be 1, matching the PyTorch mem-cat constraint)."""
    S = tokens.shape[1]
    if mem_state is None:
        mem_state = init_memory()
    mem_x_pad, mem_ent_pad, mem_len = mem_state
    assert mem_len <= MEM_PAD
    compress = (mem_len + S) > MEM_SIZE            # Python-level; at most 2 jit variants
    logits, new_x, new_e, ratio = _step(params, tokens, mem_x_pad, mem_ent_pad,
                                        mem_len, compress=compress)
    new_len = MEM_SIZE if compress else mem_len + S
    return logits, (new_x, new_e, new_len), ratio


if __name__ == "__main__":
    key = jax.random.PRNGKey(0)
    pk, tk, mk, ek = jax.random.split(key, 4)
    params = init_params(pk)

    S = 8
    tokens = jax.random.randint(tk, (1, S), 0, VOCAB_SIZE, dtype=jnp.int32)

    # Call 1: empty memory.
    logits1, state1, ratio1 = transformer_xl_forward(params, tokens, None)

    # Call 2: pre-existing 16-entry memory -> 16 + 8 = 24 > mem_size=20 -> top-k compression.
    mem_x0 = jax.random.normal(mk, (16, EMBED_DIM), jnp.float32)
    mem_ent0 = jax.random.uniform(ek, (16,), jnp.float32)
    state0 = make_memory_state(mem_x0, mem_ent0)
    logits2, state2, ratio2 = transformer_xl_forward(params, tokens, state0)

    jax.block_until_ready((logits1, state1[0], state1[1], ratio1,
                           logits2, state2[0], state2[1], ratio2))

    mem_x1, mem_ent1 = memory_view(state1)
    mem_x2, mem_ent2 = memory_view(state2)
    assert logits1.shape == (1, S, VOCAB_SIZE) and logits2.shape == (1, S, VOCAB_SIZE)
    assert mem_x1.shape == (S, EMBED_DIM) and mem_ent1.shape == (S,)
    assert mem_x2.shape == (MEM_SIZE, EMBED_DIM) and mem_ent2.shape == (MEM_SIZE,)
    assert float(ratio1) == 1.0 and 0.0 < float(ratio2) <= 1.0
    print("KERNEL_OK")
</pallas_src>

<mosaic_0001>
module attributes {stable_mosaic.version = 11 : i64} {
  func.func @_xl_kernel(%arg0: i32, %arg1: memref<1xi32, #tpu.memory_space<smem>>, %arg2: memref<8x1xi32, #tpu.memory_space<vmem>>, %arg3: memref<24x32xf32, #tpu.memory_space<vmem>>, %arg4: memref<312x128xf32, #tpu.memory_space<vmem>>, %arg5: memref<16x128xf32, #tpu.memory_space<vmem>>, %arg6: memref<8x128xf32, #tpu.memory_space<vmem>>) attributes {dimension_semantics = [#tpu.dimension_semantics<arbitrary>], iteration_bounds = array<i64: 1>, scalar_prefetch = 1 : i64, scratch_operands = 0 : i64, tpu.core_type = #tpu.core_type<tc>, window_params = [{pipeline_mode = #tpu.pipeline_mode<synchronous>, transform_indices = @transform_0, window_bounds = array<i64: 8, 1>}, {pipeline_mode = #tpu.pipeline_mode<synchronous>, transform_indices = @transform_1, window_bounds = array<i64: 24, 32>}, {pipeline_mode = #tpu.pipeline_mode<synchronous>, transform_indices = @transform_2, window_bounds = array<i64: 312, 128>}, {pipeline_mode = #tpu.pipeline_mode<synchronous>, transform_indices = @transform_3, window_bounds = array<i64: 16, 128>}, {pipeline_mode = #tpu.pipeline_mode<synchronous>, transform_indices = @transform_4, window_bounds = array<i64: 8, 128>}]} {
    %c0 = arith.constant 0 : index
    %0 = memref.load %arg1[%c0] : memref<1xi32, #tpu.memory_space<smem>>
    %c0_0 = arith.constant 0 : index
    %c0_1 = arith.constant 0 : index
    %1 = vector.load %arg5[%c0_0, %c0_1] : memref<16x128xf32, #tpu.memory_space<vmem>>, vector<16x128xf32>
    %2 = vector.extract_strided_slice %1 {offsets = [0, 0], sizes = [1, 128], strides = [1, 1]} : vector<16x128xf32> to vector<1x128xf32>
    %3 = vector.extract_strided_slice %1 {offsets = [1, 0], sizes = [1, 32], strides = [1, 1]} : vector<16x128xf32> to vector<1x32xf32>
    %4 = vector.extract_strided_slice %1 {offsets = [2, 0], sizes = [1, 32], strides = [1, 1]} : vector<16x128xf32> to vector<1x32xf32>
    %5 = vector.extract_strided_slice %1 {offsets = [3, 0], sizes = [1, 32], strides = [1, 1]} : vector<16x128xf32> to vector<1x32xf32>
    %6 = vector.extract_strided_slice %1 {offsets = [4, 0], sizes = [1, 128], strides = [1, 1]} : vector<16x128xf32> to vector<1x128xf32>
    %7 = vector.extract_strided_slice %1 {offsets = [5, 0], sizes = [1, 32], strides = [1, 1]} : vector<16x128xf32> to vector<1x32xf32>
    %8 = vector.extract_strided_slice %1 {offsets = [6, 0], sizes = [1, 32], strides = [1, 1]} : vector<16x128xf32> to vector<1x32xf32>
    %9 = vector.extract_strided_slice %1 {offsets = [7, 0], sizes = [1, 32], strides = [1, 1]} : vector<16x128xf32> to vector<1x32xf32>
    %10 = vector.extract_strided_slice %1 {offsets = [8, 0], sizes = [1, 128], strides = [1, 1]} : vector<16x128xf32> to vector<1x128xf32>
    %11 = vector.extract_strided_slice %1 {offsets = [9, 0], sizes = [1, 128], strides = [1, 1]} : vector<16x128xf32> to vector<1x128xf32>
    %12 = vector.extract_strided_slice %1 {offsets = [10, 0], sizes = [1, 128], strides = [1, 1]} : vector<16x128xf32> to vector<1x128xf32>
    %c0_2 = arith.constant 0 : index
    %c0_3 = arith.constant 0 : index
    %13 = vector.load %arg2[%c0_2, %c0_3] : memref<8x1xi32, #tpu.memory_space<vmem>>, vector<8x1xi32>
    %14 = tpu.iota {dimensions = array<i32: 1>} : vector<8x56xi32>
    %15 = vector.broadcast %13 : vector<8x1xi32> to vector<8x56xi32>
    %16 = arith.cmpi eq, %14, %15 : vector<8x56xi32>
    %17 = arith.extui %16 : vector<8x56xi1> to vector<8x56xi32>
    %18 = arith.sitofp %17 : vector<8x56xi32> to vector<8x56xf32>
    %c0_4 = arith.constant 0 : index
    %c0_5 = arith.constant 0 : index
    %19 = vector.load %arg4[%c0_4, %c0_5] : memref<312x128xf32, #tpu.memory_space<vmem>>, vector<56x128xf32>
    %cst = arith.constant dense<0.000000e+00> : vector<8x128xf32>
    %20 = tpu.matmul %18, %19, %cst {dimension_numbers = #tpu.dot_dimension_numbers<[1], [0], [0], [1], [0, 0, 1, 1], [], []>} : vector<8x56xf32>, vector<56x128xf32>, vector<8x128xf32> -> vector<8x128xf32>
    %21 = vector.extract_strided_slice %20 {offsets = [0, 0], sizes = [8, 32], strides = [1, 1]} : vector<8x128xf32> to vector<8x32xf32>
    %c0_6 = arith.constant 0 : index
    %c0_7 = arith.constant 0 : index
    %22 = vector.load %arg3[%c0_6, %c0_7] : memref<24x32xf32, #tpu.memory_space<vmem>>, vector<24x32xf32>
    %23 = tpu.concatenate %22, %21 in 0 : vector<24x32xf32>, vector<8x32xf32> -> vector<32x32xf32>
    %c56 = arith.constant 56 : index
    %c0_8 = arith.constant 0 : index
    %24 = vector.load %arg4[%c56, %c0_8] : memref<312x128xf32, #tpu.memory_space<vmem>>, vector<32x128xf32>
    %cst_9 = arith.constant dense<0.000000e+00> : vector<32x128xf32>
    %25 = tpu.matmul %23, %24, %cst_9 {dimension_numbers = #tpu.dot_dimension_numbers<[1], [0], [0], [1], [0, 0, 1, 1], [], []>} : vector<32x32xf32>, vector<32x128xf32>, vector<32x128xf32> -> vector<32x128xf32>
    %26 = vector.broadcast %2 : vector<1x128xf32> to vector<32x128xf32>
    %27 = arith.addf %25, %26 : vector<32x128xf32>
    %28 = vector.extract_strided_slice %27 {offsets = [24, 0], sizes = [8, 32], strides = [1, 1]} : vector<32x128xf32> to vector<8x32xf32>
    %29 = vector.extract_strided_slice %27 {offsets = [0, 32], sizes = [32, 32], strides = [1, 1]} : vector<32x128xf32> to vector<32x32xf32>
    %30 = vector.extract_strided_slice %27 {offsets = [0, 64], sizes = [32, 32], strides = [1, 1]} : vector<32x128xf32> to vector<32x32xf32>
    %31 = tpu.transpose %29, [1, 0] : vector<32x32xf32> -> vector<32x32xf32>
    %32 = tpu.iota {dimensions = array<i32: 1>} : vector<8x32xi32>
    %33 = vector.broadcast %0 : i32 to vector<8x32xi32>
    %34 = arith.cmpi slt, %32, %33 : vector<8x32xi32>
    %c24_i32 = arith.constant 24 : i32
    %35 = vector.broadcast %c24_i32 : i32 to vector<8x32xi32>
    %36 = arith.cmpi sge, %32, %35 : vector<8x32xi32>
    %37 = arith.ori %34, %36 : vector<8x32xi1>
    %cst_10 = arith.constant 0.000000e+00 : f32
    %cst_11 = arith.constant -1.000000e+30 : f32
    %38 = vector.broadcast %cst_10 : f32 to vector<8x32xf32>
    %39 = vector.broadcast %cst_11 : f32 to vector<8x32xf32>
    %40 = arith.select %37, %38, %39 : vector<8x32xi1>, vector<8x32xf32>
    %cst_12 = arith.constant 0.000000e+00 : f32
    %41 = vector.broadcast %cst_12 : f32 to vector<8x32xf32>
    %cst_13 = arith.constant 0.000000e+00 : f32
    %42 = vector.broadcast %cst_13 : f32 to vector<8x128xf32>
    %43 = vector.extract_strided_slice %28 {offsets = [0, 0], sizes = [8, 16], strides = [1, 1]} : vector<8x32xf32> to vector<8x16xf32>
    %44 = vector.extract_strided_slice %31 {offsets = [0, 0], sizes = [16, 32], strides = [1, 1]} : vector<32x32xf32> to vector<16x32xf32>
    %45 = vector.extract_strided_slice %30 {offsets = [0, 0], sizes = [32, 16], strides = [1, 1]} : vector<32x32xf32> to vector<32x16xf32>
    %cst_14 = arith.constant dense<0.000000e+00> : vector<8x32xf32>
    %46 = tpu.matmul %43, %44, %cst_14 {dimension_numbers = #tpu.dot_dimension_numbers<[1], [0], [0], [1], [0, 0, 1, 1], [], []>} : vector<8x16xf32>, vector<16x32xf32>, vector<8x32xf32> -> vector<8x32xf32>
    %47 = arith.addf %46, %40 : vector<8x32xf32>
    %cst_15 = arith.constant dense<0xFF800000> : vector<8xf32>
    %48 = vector.multi_reduction <maximumf>, %47, %cst_15 [1] : vector<8x32xf32> to vector<8xf32>
    %49 = vector.shape_cast %48 : vector<8xf32> to vector<8x1xf32>
    %50 = vector.broadcast %49 : vector<8x1xf32> to vector<8x32xf32>
    %51 = arith.subf %47, %50 : vector<8x32xf32>
    %52 = math.exp %51 : vector<8x32xf32>
    %cst_16 = arith.constant dense<0.000000e+00> : vector<8xf32>
    %53 = vector.multi_reduction <add>, %52, %cst_16 [1] : vector<8x32xf32> to vector<8xf32>
    %54 = vector.shape_cast %53 : vector<8xf32> to vector<8x1xf32>
    %55 = vector.broadcast %54 : vector<8x1xf32> to vector<8x32xf32>
    %56 = arith.divf %52, %55 : vector<8x32xf32>
    %57 = arith.addf %41, %56 : vector<8x32xf32>
    %cst_17 = arith.constant dense<0.000000e+00> : vector<8x16xf32>
    %58 = tpu.matmul %56, %45, %cst_17 {dimension_numbers = #tpu.dot_dimension_numbers<[1], [0], [0], [1], [0, 0, 1, 1], [], []>} : vector<8x32xf32>, vector<32x16xf32>, vector<8x16xf32> -> vector<8x16xf32>
    %c88 = arith.constant 88 : index
    %c0_18 = arith.constant 0 : index
    %59 = vector.load %arg4[%c88, %c0_18] : memref<312x128xf32, #tpu.memory_space<vmem>>, vector<16x128xf32>
    %cst_19 = arith.constant dense<0.000000e+00> : vector<8x128xf32>
    %60 = tpu.matmul %58, %59, %cst_19 {dimension_numbers = #tpu.dot_dimension_numbers<[1], [0], [0], [1], [0, 0, 1, 1], [], []>} : vector<8x16xf32>, vector<16x128xf32>, vector<8x128xf32> -> vector<8x128xf32>
    %61 = arith.addf %42, %60 : vector<8x128xf32>
    %62 = vector.extract_strided_slice %28 {offsets = [0, 16], sizes = [8, 16], strides = [1, 1]} : vector<8x32xf32> to vector<8x16xf32>
    %63 = vector.extract_strided_slice %31 {offsets = [16, 0], sizes = [16, 32], strides = [1, 1]} : vector<32x32xf32> to vector<16x32xf32>
    %64 = vector.extract_strided_slice %30 {offsets = [0, 16], sizes = [32, 16], strides = [1, 1]} : vector<32x32xf32> to vector<32x16xf32>
    %cst_20 = arith.constant dense<0.000000e+00> : vector<8x32xf32>
    %65 = tpu.matmul %62, %63, %cst_20 {dimension_numbers = #tpu.dot_dimension_numbers<[1], [0], [0], [1], [0, 0, 1, 1], [], []>} : vector<8x16xf32>, vector<16x32xf32>, vector<8x32xf32> -> vector<8x32xf32>
    %66 = arith.addf %65, %40 : vector<8x32xf32>
    %cst_21 = arith.constant dense<0xFF800000> : vector<8xf32>
    %67 = vector.multi_reduction <maximumf>, %66, %cst_21 [1] : vector<8x32xf32> to vector<8xf32>
    %68 = vector.shape_cast %67 : vector<8xf32> to vector<8x1xf32>
    %69 = vector.broadcast %68 : vector<8x1xf32> to vector<8x32xf32>
    %70 = arith.subf %66, %69 : vector<8x32xf32>
    %71 = math.exp %70 : vector<8x32xf32>
    %cst_22 = arith.constant dense<0.000000e+00> : vector<8xf32>
    %72 = vector.multi_reduction <add>, %71, %cst_22 [1] : vector<8x32xf32> to vector<8xf32>
    %73 = vector.shape_cast %72 : vector<8xf32> to vector<8x1xf32>
    %74 = vector.broadcast %73 : vector<8x1xf32> to vector<8x32xf32>
    %75 = arith.divf %71, %74 : vector<8x32xf32>
    %76 = arith.addf %57, %75 : vector<8x32xf32>
    %cst_23 = arith.constant dense<0.000000e+00> : vector<8x16xf32>
    %77 = tpu.matmul %75, %64, %cst_23 {dimension_numbers = #tpu.dot_dimension_numbers<[1], [0], [0], [1], [0, 0, 1, 1], [], []>} : vector<8x32xf32>, vector<32x16xf32>, vector<8x16xf32> -> vector<8x16xf32>
    %c104 = arith.constant 104 : index
    %c0_24 = arith.constant 0 : index
    %78 = vector.load %arg4[%c104, %c0_24] : memref<312x128xf32, #tpu.memory_space<vmem>>, vector<16x128xf32>
    %cst_25 = arith.constant dense<0.000000e+00> : vector<8x128xf32>
    %79 = tpu.matmul %77, %78, %cst_25 {dimension_numbers = #tpu.dot_dimension_numbers<[1], [0], [0], [1], [0, 0, 1, 1], [], []>} : vector<8x16xf32>, vector<16x128xf32>, vector<8x128xf32> -> vector<8x128xf32>
    %80 = arith.addf %61, %79 : vector<8x128xf32>
    %81 = vector.extract_strided_slice %80 {offsets = [0, 0], sizes = [8, 32], strides = [1, 1]} : vector<8x128xf32> to vector<8x32xf32>
    %82 = vector.broadcast %3 : vector<1x32xf32> to vector<8x32xf32>
    %83 = arith.addf %81, %82 : vector<8x32xf32>
    %cst_26 = arith.constant 5.000000e-01 : f32
    %84 = vector.broadcast %cst_26 : f32 to vector<8x32xf32>
    %85 = arith.mulf %76, %84 : vector<8x32xf32>
    %cst_27 = arith.constant 1.000000e-10 : f32
    %86 = vector.broadcast %cst_27 : f32 to vector<8x32xf32>
    %87 = arith.addf %85, %86 : vector<8x32xf32>
    %88 = math.log %87 : vector<8x32xf32>
    %89 = arith.mulf %85, %88 : vector<8x32xf32>
    %cst_28 = arith.constant dense<0.000000e+00> : vector<8xf32>
    %90 = vector.multi_reduction <add>, %89, %cst_28 [1] : vector<8x32xf32> to vector<8xf32>
    %91 = vector.shape_cast %90 : vector<8xf32> to vector<8x1xf32>
    %cst_29 = arith.constant 0.000000e+00 : f32
    %92 = vector.broadcast %cst_29 : f32 to vector<8x1xf32>
    %93 = arith.subf %92, %91 : vector<8x1xf32>
    %94 = arith.addf %21, %83 : vector<8x32xf32>
    %cst_30 = arith.constant dense<0.000000e+00> : vector<8xf32>
    %95 = vector.multi_reduction <add>, %94, %cst_30 [1] : vector<8x32xf32> to vector<8xf32>
    %96 = vector.shape_cast %95 : vector<8xf32> to vector<8x1xf32>
    %cst_31 = arith.constant 3.200000e+01 : f32
    %97 = vector.broadcast %cst_31 : f32 to vector<8x1xf32>
    %98 = arith.divf %96, %97 : vector<8x1xf32>
    %99 = vector.broadcast %98 : vector<8x1xf32> to vector<8x32xf32>
    %100 = arith.subf %94, %99 : vector<8x32xf32>
    %101 = arith.mulf %100, %100 : vector<8x32xf32>
    %cst_32 = arith.constant dense<0.000000e+00> : vector<8xf32>
    %102 = vector.multi_reduction <add>, %101, %cst_32 [1] : vector<8x32xf32> to vector<8xf32>
    %103 = vector.shape_cast %102 : vector<8xf32> to vector<8x1xf32>
    %cst_33 = arith.constant 3.200000e+01 : f32
    %104 = vector.broadcast %cst_33 : f32 to vector<8x1xf32>
    %105 = arith.divf %103, %104 : vector<8x1xf32>
    %106 = vector.broadcast %98 : vector<8x1xf32> to vector<8x32xf32>
    %107 = arith.subf %94, %106 : vector<8x32xf32>
    %cst_34 = arith.constant 9.99999974E-6 : f32
    %108 = vector.broadcast %cst_34 : f32 to vector<8x1xf32>
    %109 = arith.addf %105, %108 : vector<8x1xf32>
    %110 = math.rsqrt %109 : vector<8x1xf32>
    %111 = vector.broadcast %110 : vector<8x1xf32> to vector<8x32xf32>
    %112 = arith.mulf %107, %111 : vector<8x32xf32>
    %113 = vector.broadcast %4 : vector<1x32xf32> to vector<8x32xf32>
    %114 = arith.mulf %112, %113 : vector<8x32xf32>
    %115 = vector.broadcast %5 : vector<1x32xf32> to vector<8x32xf32>
    %116 = arith.addf %114, %115 : vector<8x32xf32>
    %c120 = arith.constant 120 : index
    %c0_35 = arith.constant 0 : index
    %117 = vector.load %arg4[%c120, %c0_35] : memref<312x128xf32, #tpu.memory_space<vmem>>, vector<32x128xf32>
    %cst_36 = arith.constant dense<0.000000e+00> : vector<8x128xf32>
    %118 = tpu.matmul %116, %117, %cst_36 {dimension_numbers = #tpu.dot_dimension_numbers<[1], [0], [0], [1], [0, 0, 1, 1], [], []>} : vector<8x32xf32>, vector<32x128xf32>, vector<8x128xf32> -> vector<8x128xf32>
    %119 = vector.broadcast %6 : vector<1x128xf32> to vector<8x128xf32>
    %120 = arith.addf %118, %119 : vector<8x128xf32>
    %cst_37 = arith.constant 0.000000e+00 : f32
    %121 = vector.broadcast %cst_37 : f32 to vector<8x128xf32>
    %122 = arith.maximumf %120, %121 : vector<8x128xf32>
    %c152 = arith.constant 152 : index
    %c0_38 = arith.constant 0 : index
    %123 = vector.load %arg4[%c152, %c0_38] : memref<312x128xf32, #tpu.memory_space<vmem>>, vector<128x128xf32>
    %cst_39 = arith.constant dense<0.000000e+00> : vector<8x128xf32>
    %124 = tpu.matmul %122, %123, %cst_39 {dimension_numbers = #tpu.dot_dimension_numbers<[1], [0], [0], [1], [0, 0, 1, 1], [], []>} : vector<8x128xf32>, vector<128x128xf32>, vector<8x128xf32> -> vector<8x128xf32>
    %125 = vector.extract_strided_slice %124 {offsets = [0, 0], sizes = [8, 32], strides = [1, 1]} : vector<8x128xf32> to vector<8x32xf32>
    %126 = vector.broadcast %7 : vector<1x32xf32> to vector<8x32xf32>
    %127 = arith.addf %125, %126 : vector<8x32xf32>
    %128 = arith.addf %116, %127 : vector<8x32xf32>
    %cst_40 = arith.constant dense<0.000000e+00> : vector<8xf32>
    %129 = vector.multi_reduction <add>, %128, %cst_40 [1] : vector<8x32xf32> to vector<8xf32>
    %130 = vector.shape_cast %129 : vector<8xf32> to vector<8x1xf32>
    %cst_41 = arith.constant 3.200000e+01 : f32
    %131 = vector.broadcast %cst_41 : f32 to vector<8x1xf32>
    %132 = arith.divf %130, %131 : vector<8x1xf32>
    %133 = vector.broadcast %132 : vector<8x1xf32> to vector<8x32xf32>
    %134 = arith.subf %128, %133 : vector<8x32xf32>
    %135 = arith.mulf %134, %134 : vector<8x32xf32>
    %cst_42 = arith.constant dense<0.000000e+00> : vector<8xf32>
    %136 = vector.multi_reduction <add>, %135, %cst_42 [1] : vector<8x32xf32> to vector<8xf32>
    %137 = vector.shape_cast %136 : vector<8xf32> to vector<8x1xf32>
    %cst_43 = arith.constant 3.200000e+01 : f32
    %138 = vector.broadcast %cst_43 : f32 to vector<8x1xf32>
    %139 = arith.divf %137, %138 : vector<8x1xf32>
    %140 = vector.broadcast %132 : vector<8x1xf32> to vector<8x32xf32>
    %141 = arith.subf %128, %140 : vector<8x32xf32>
    %cst_44 = arith.constant 9.99999974E-6 : f32
    %142 = vector.broadcast %cst_44 : f32 to vector<8x1xf32>
    %143 = arith.addf %139, %142 : vector<8x1xf32>
    %144 = math.rsqrt %143 : vector<8x1xf32>
    %145 = vector.broadcast %144 : vector<8x1xf32> to vector<8x32xf32>
    %146 = arith.mulf %141, %145 : vector<8x32xf32>
    %147 = vector.broadcast %8 : vector<1x32xf32> to vector<8x32xf32>
    %148 = arith.mulf %146, %147 : vector<8x32xf32>
    %149 = vector.broadcast %9 : vector<1x32xf32> to vector<8x32xf32>
    %150 = arith.addf %148, %149 : vector<8x32xf32>
    %c280 = arith.constant 280 : index
    %c0_45 = arith.constant 0 : index
    %151 = vector.load %arg4[%c280, %c0_45] : memref<312x128xf32, #tpu.memory_space<vmem>>, vector<32x128xf32>
    %cst_46 = arith.constant dense<0.000000e+00> : vector<8x128xf32>
    %152 = tpu.matmul %150, %151, %cst_46 {dimension_numbers = #tpu.dot_dimension_numbers<[1], [0], [0], [1], [0, 0, 1, 1], [], []>} : vector<8x32xf32>, vector<32x128xf32>, vector<8x128xf32> -> vector<8x128xf32>
    %153 = vector.broadcast %10 : vector<1x128xf32> to vector<8x128xf32>
    %154 = arith.addf %152, %153 : vector<8x128xf32>
    %155 = vector.broadcast %12 : vector<1x128xf32> to vector<8x128xf32>
    %156 = arith.mulf %20, %155 : vector<8x128xf32>
    %157 = arith.addf %154, %156 : vector<8x128xf32>
    %158 = vector.broadcast %93 : vector<8x1xf32> to vector<8x128xf32>
    %159 = vector.broadcast %11 : vector<1x128xf32> to vector<8x128xf32>
    %160 = arith.mulf %158, %159 : vector<8x128xf32>
    %161 = arith.addf %157, %160 : vector<8x128xf32>
    %c0_47 = arith.constant 0 : index
    %c0_48 = arith.constant 0 : index
    %162 = vector.load %arg6[%c0_47, %c0_48] : memref<8x128xf32, #tpu.memory_space<vmem>>, vector<8x128xf32>
    tpu.vector_store %arg6[%c0_47, %c0_48], %161 {strides = array<i32>} : memref<8x128xf32, #tpu.memory_space<vmem>>, vector<8x128xf32>,
    return
  }
  func.func @transform_0(%arg0: i32, %arg1: memref<1xi32, #tpu.memory_space<smem>>) -> (i32, i32) {
    %c0_i32 = arith.constant 0 : i32
    %c0_i32_0 = arith.constant 0 : i32
    %c0_i32_1 = arith.constant 0 : i32
    return %c0_i32, %c0_i32_0 : i32, i32
  }
  func.func @transform_1(%arg0: i32, %arg1: memref<1xi32, #tpu.memory_space<smem>>) -> (i32, i32) {
    %c0_i32 = arith.constant 0 : i32
    %c0_i32_0 = arith.constant 0 : i32
    %c0_i32_1 = arith.constant 0 : i32
    return %c0_i32, %c0_i32_0 : i32, i32
  }
  func.func @transform_2(%arg0: i32, %arg1: memref<1xi32, #tpu.memory_space<smem>>) -> (i32, i32) {
    %c0_i32 = arith.constant 0 : i32
    %c0_i32_0 = arith.constant 0 : i32
    %c0_i32_1 = arith.constant 0 : i32
    return %c0_i32, %c0_i32_0 : i32, i32
  }
  func.func @transform_3(%arg0: i32, %arg1: memref<1xi32, #tpu.memory_space<smem>>) -> (i32, i32) {
    %c0_i32 = arith.constant 0 : i32
    %c0_i32_0 = arith.constant 0 : i32
    %c0_i32_1 = arith.constant 0 : i32
    return %c0_i32, %c0_i32_0 : i32, i32
  }
  func.func @transform_4(%arg0: i32, %arg1: memref<1xi32, #tpu.memory_space<smem>>) -> (i32, i32) {
    %c0_i32 = arith.constant 0 : i32
    %c0_i32_0 = arith.constant 0 : i32
    %c0_i32_1 = arith.constant 0 : i32
    return %c0_i32, %c0_i32_0 : i32, i32
  }
}

</mosaic_0001>

<bundles_post_ra>
// kernel: _step.1
= control target key start
LH: loop header
LB: loop body
LE: loop exit
PB: predicated region body
PF: predicated region fallthrough
CT: control target
= control target key end

     0   :  { %11 = vsyncpa [#allocation5], 0  ;;  %s1518_s18 = smov [#allocation4]   ;;  %s1745_s0 = inlined_call_operand.<no memory space> [shape: s32[1], index: 0, kind: input, shape index: {}]   ;;  %s1746_s1 = inlined_call_operand.vmem [shape: s32[8,1], index: 1, kind: input, shape index: {}]   ;;  %s1747_s2 = inlined_call_operand.vmem [shape: f32[24,32], index: 2, kind: input, shape index: {}]   ;;  %s1748_s3 = inlined_call_operand.hbm [shape: f32[312,128], index: 3, kind: input, shape index: {}]   ;;  %s1749_s4 = inlined_call_operand.vmem [shape: f32[16,128], index: 4, kind: input, shape index: {}]   ;;  %s1750_s5 = inlined_call_operand.vmem [shape: f32[8,128], index: 5, kind: output, shape index: {}]  }
   0x1   :  { %s21_s19 = sshll.u32 %s1518_s18, 4  ;;  %s1494_s22 = scalar_lea.hbm %s1748_s3, 4992  ;;  %s22_s19 = int_to_ptr.vmem [resolvable:$true] %s21_s19 }
   0x2   :  { %p1495_p0 = scmp.ne.s32.totalorder %s1748_s3, %s1494_s22  ;;  %p1498_p1 = scmp.lt.u32.totalorder %s1494_s22, %s1748_s3 }
   0x4   :  { %p1500_p2 = pnand %p1498_p1, %p1495_p0 }
   0x6   :  { %1503 = shalt.err (!%p1500_p2)
}
   0x7   :  { %s1504_s27 = scalar_lea.vmem %s22_s19, 4992  ;;  %p1509_p4 = scmp.lt.s32.totalorder %s22_s19, %s22_s19 }
   0x8   :  { %p1505_p3 = scmp.ne.s32.totalorder %s22_s19, %s1504_s27  ;;  %p1510_p5 = scmp.lt.s32.totalorder %s1504_s27, %s1504_s27 }
   0xa   :  { %p1511_p6 = por %p1510_p5, %p1509_p4 }
   0xc   :  { %p1512_p7 = pnand %p1511_p6, %p1505_p3 }
   0xe   :  { %1515 = shalt.err (!%p1512_p7)
}
   0xf   :  { %s1519_s28 = smov 128   ;;  %s1520_s29 = smov 8  }
  0x10   :  { %27 = dma.hbm_to_vmem [thread:$0]  %s1748_s3, 4992, %s22_s19, [#allocation5], %s1519_s28, %s1519_s28, %s1520_s29  }
  0x11   :  { %1516 = dma.done.wait [#allocation5], 4992  }
  0x12   :  { %1517 = vsyncadd [#allocation5], 4294962304  ;;  %v1521_v0 = vmov 0   ;;  %v1522_v1 = vmov 0.0|0.0   ;;  %v36_v2 = vld [vmem:[%s1746_s1] sm:$0xff]  ;;  %v46_v4 = vld [vmem:[#allocation4 + $0x8] sm:$0xff]  ;;  %v37_v17 = vlaneseq  ;;  %v235_v56 = vstv %s1745_s0 }
  0x13   :  { %1439 = vset.pattern.permute.xlu0 %v1521_v0  ;;  %1339 = vmatprep.subr.bf16.mxu0 %v1522_v1  ;;  %v45_v3 = vld [vmem:[#allocation4] sm:$0xff]  ;;  %v47_v6 = vld [vmem:[#allocation4 + $0x10] sm:$0xff]  ;;  %v48_v7 = vld [vmem:[#allocation4 + $0x18] sm:$0xff]  ;;  %vm1523_vm0 = vmmov 0   ;;  %v1524_v8 = vmov 0.0   ;;  %vm52_vm1 = vcmask 457728  }
  0x14   :  { %1356 = vmatprep.subr.bf16.mxu1 %v1522_v1  ;;  %40 = vperm.xlu0 %1439, %v36_v2   ;;  %v1340_v5 = vpack.c.bf16 %v46_v4, %v45_v3  ;;  %v1343_v9 = vpack.c.bf16 %v48_v7, %v47_v6  ;;  %v49_v10 = vld [vmem:[#allocation4 + $0x20] sm:$0xff]  ;;  %v50_v11 = vld [vmem:[#allocation4 + $0x28] sm:$0xff]  ;;  %v129_v13 = vld [vmem:[#allocation4 + $0x38] sm:$0xff]  ;;  %v1585_v18 = vand.u32 127, %v37_v17  ;;  %vm137_vm3 = vcmask 261120   ;;  %s1525_s16 = smov 96  }
  0x15   :  { %1207 = vmatprep.mubr.msk.f32.mxu0 %vm1523_vm0, %v1524_v8  ;;  %1232 = vmatprep.mubr.msk.f32.mxu1 %vm1523_vm0, %v1524_v8  ;;  %v1346_v12 = vpack.c.bf16 %v50_v11, %v49_v10  ;;  %v130_v14 = vld [vmem:[#allocation4 + $0x40] sm:$0xff]  ;;  %v51_v15 = vld [vmem:[#allocation4 + $0x30] sm:$0xff]  ;;  %v131_v19 = vld [vmem:[#allocation4 + $0x48] sm:$0xff]  ;;  %v1602_v27 = vshrl.u32 %v37_v17, 7  ;;  %vm252_vm4 = vcmask 130048   ;;  %s1527_s18 = smov 64  }
  0x16   :  { %1341 = vmatpush3.bf16.msra.mxu0 %v1340_v5  ;;  %v1348_v16 = vpack.c.bf16 %v130_v14, %v129_v13  ;;  %v132_v20 = vld [vmem:[#allocation4 + $0x50] sm:$0xff]  ;;  %v126_v23 = vld [vmem:[%s1747_s2] sm:$0xff]  ;;  %v127_v25 = vld [vmem:[%s1747_s2 + $0x8] sm:$0xff]  ;;  %vm236_vm6 = vcmp.lt.s32.totalorder %v1585_v18, %v235_v56  ;;  %vm237_vm7 = vcmp.ge.s32.totalorder %v1585_v18, 24  ;;  %v1526_v57 = vmov -1e+30  }
  0x17   :  { %1342 = vmatprep.subr.bf16.mxu0 %v1522_v1  ;;  %v1352_v22 = vpack.c.bf16 %v132_v20, %v131_v19  ;;  %v128_v26 = vld [vmem:[%s1747_s2 + $0x10] sm:$0xff]  ;;  %v798_v28 = vsub.s32 2, %v1602_v27  ;;  %v1608_v29 = vld [vmem:[%s1749_s4 + $0x8] sm:$0xff]  ;;  %v135_v34 = vsub.s32 0, %v1602_v27  ;;  %v1624_v35 = vld [vmem:[%s1749_s4] sm:$0xff]  ;;  %s1528_s19 = smov 80  }
  0x18   :  { %vm1636_vm5 = vmpackc.low %vm252_vm4, %vm252_vm4  ;;  %s1529_s0 = smov 112   ;;  %s1530_s20 = smov 48  }
  0x19   :  { %v1087_v30 = vrot.slane %v1608_v29, %v798_v28  ;;  %v136_v36 = vrot.slane %v1624_v35, %v135_v34  ;;  %vm238_vm8 = vmor %vm236_vm6, %vm237_vm7 }
  0x1a   :  { %1344 = vmatpush3.bf16.msra.mxu0 %v1343_v9  ;;  %v239_v58 = vsel %vm238_vm8, 0.0, %v1526_v57 }
  0x1b   :  { %1345 = vmatprep.subr.bf16.mxu0 %v1522_v1 }
  0x1e   :  { %1347 = vmatpush3.bf16.msra.mxu0 %v1346_v12 }
  0x1f   :  { %1205 = vmatprep.subr.mxu0 %v1524_v8 }
  0x22   :  { %1206 = vmatpush3.msra.mxu0 %v51_v15 }
  0x23   :  { %1349 = vmatprep.subr.bf16.mxu0 %v1348_v16 }
  0x93   :  { %v41_v21 = vpop.permute.xlu0 %40 }
  0x94   :  { %vm42_vm2 = vcmp.eq.s32.totalorder %v1585_v18, %v41_v21 }
  0x95   :  { %v1102_v24 = vsel %vm42_vm2, 1.0, %v1524_v8 }
  0x96   :  { %1208 = vmatmul.mubr.msk.f32.vlgmr.msra.gmra.mrb[0].mxu0 %vm52_vm1, %v1102_v24 }
  0x97   :  { %1351 = vmatpush3.bf16.msra.mxu0 %v1348_v16  ;;  %1218 = vmatprep.mubr.msk.f32.mxu0 %vm137_vm3, %v126_v23 }
  0x98   :  { %1353 = vmatprep.subr.bf16.mxu0 %v1352_v22 }
  0x9b   :  { %1355 = vmatpush3.bf16.msra.mxu0 %v1352_v22 }
  0x9c   :  { %1364 = vmatprep.subr.bf16.mxu0 %v1522_v1 }
  0x9e   :  { %1219 = vmatmul.mubr.msk.f32.vlgmr.msra.gmra.mrb[2].mxu0 %vm137_vm3, %v127_v25 }
  0x9f   :  { %1221 = vmatprep.mubr.msk.f32.mxu0 %vm137_vm3, %v128_v26 }
 0x169   :  { %v1613_v31 = vpop.f32.mrb[0].mxu0 }
 0x16a   :  { %v1616_v32 = vmul.f32 %v1087_v30, %v1613_v31  ;;  %v1209_v33 = vpop.f32.mrb[1].mxu0  ;;  %1222 = vmatmul.mubr.msk.f32.gmra.mrb[4].mxu0 %vm137_vm3, %v1613_v31 }
 0x16b   :  { %1243 = vmatprep.mubr.msk.f32.mxu0 %vm1523_vm0, %v1524_v8 }
 0x171   :  { %v1220_v37 = vpop.f32.mrb[2].mxu0 }
 0x172   :  { %v222_v38 = vadd.f32 %v1220_v37, %v136_v36  ;;  %v216_v39 = vpop.f32.mrb[3].mxu0 }
 0x173   :  { %v217_v40 = vadd.f32 %v216_v39, %v136_v36 }
 0x175   :  { %v1631_v41 = vpack.i.bf16 %v222_v38, %v217_v40 }
 0x177   :  { %1441 = vrot.lane.b32.xlu0 %v1631_v41, %s1525_s16 }
 0x1e9   :  { %v1442_v42 = vpop.permute.xlu0 %1441 }
 0x1ea   :  { %v1444_v43 = vunpack.i.h.bf16 %v1442_v42  ;;  %v1443_v44 = vunpack.i.l.bf16 %v1442_v42 }
 0x1ec   :  { %v1357_v46 = vpack.c.bf16 %v1444_v43, %v1443_v44 }
 0x1ee   :  { %1359 = vmatpush3.bf16.xpose.msk.msra.mxu1 %vm1636_vm5, %v1357_v46 }
 0x1ef   :  { %1360 = vmatprep.subr.bf16.mxu1 %v1522_v1 }
 0x23d   :  { %v1223_v47 = vpop.f32.mrb[4].mxu0 }
 0x23e   :  { %v232_v48 = vadd.f32 %v1223_v47, %v136_v36  ;;  %v226_v49 = vpop.f32.mrb[5].mxu0 }
 0x23f   :  { %v227_v50 = vadd.f32 %v226_v49, %v136_v36 }
 0x241   :  { %v1643_v51 = vpack.i.bf16 %v232_v48, %v227_v50 }
 0x243   :  { %1446 = vrot.lane.b32.xlu1 %v1643_v51, %s1525_s16 }
 0x2b5   :  { %v1447_v52 = vpop.permute.xlu1 %1446 }
 0x2b6   :  { %v1449_v53 = vunpack.i.h.bf16 %v1447_v52  ;;  %v1448_v54 = vunpack.i.l.bf16 %v1447_v52 }
 0x2b8   :  { %v1361_v55 = vpack.c.bf16 %v1449_v53, %v1448_v54  ;;  %v619_v54 = vld [vmem:[#allocation4 + $0x68] sm:$0xff] }
 0x2ba   :  { %1363 = vmatpush3.bf16.xpose.msk.msra.mxu1 %vm1636_vm5, %v1361_v55  ;;  %v620_v55 = vld [vmem:[#allocation4 + $0x70] sm:$0xff] }
 0x2bb   :  { %1378 = vmatprep.subr.bf16.mxu1 %v1522_v1  ;;  %v1385_v57 = vpack.c.bf16 %v620_v55, %v619_v54  ;;  %v900_v54 = vld [vmem:[#allocation4 + $0xf8] sm:$0xff]  ;;  %v901_v55 = vld [vmem:[#allocation4 + $0x100] sm:$0xff] }
 0x2c1   :  { %1233 = vmatmul.mubr.msk.f32.vlgmr.msra.gmra.mrb[0].mxu1 %vm252_vm4, %v232_v48 }
 0x2c2   :  { %1265 = vmatprep.mubr.msk.f32.mxu1 %vm1523_vm0, %v1524_v8 }
 0x394   :  { %v329_v59 = vpop.f32.mrb[0].mxu1 }
 0x395   :  { %v330_v60 = vadd.f32 %v329_v59, %v239_v58  ;;  %v1234_v61 = vpop.f32.mrb[1].mxu1  ;;  %v431_v59 = vld [vmem:[#allocation4 + $0x60] sm:$0xff] }
 0x397   :  { %v333_v62 = vsel %vm137_vm3, %v330_v60, -inf }
 0x398   :  { %334 = vmax.xlane.f32.xlu1 %v333_v62 }
 0x3a9   :  { %1456 = vrot.lane.b32.xlu1 %v1643_v51, %s1527_s18 }
 0x3ad   :  { %1461 = vrot.lane.b32.xlu1 %v1631_v41, %s1528_s19 }
 0x3b1   :  { %432 = vrot.lane.b32.xlu1 %v232_v48, %s1529_s0 }
 0x425   :  { %v335_v63 = vpop.xlane.xlu1 %334 }
 0x426   :  { %v336_v0 = vsub.f32 %v330_v60, %v335_v63  ;;  %v769_v63 = vsub.s32 1, %v1602_v27 }
 0x428   :  { %v337_v2 = vmul.f32 1.442695, %v336_v0 }
 0x429   :  { %v1457_v6 = vpop.permute.xlu1 %1456 }
 0x42a   :  { %1480 = vpow2.f32 %v337_v2  ;;  %v1459_v11 = vunpack.i.h.bf16 %v1457_v6  ;;  %v1458_v12 = vunpack.i.l.bf16 %v1457_v6 }
 0x42c   :  { %v1368_v15 = vpack.c.bf16 %v1459_v11, %v1458_v12 }
 0x42d   :  { %v1462_v16 = vpop.permute.xlu1 %1461 }
 0x42e   :  { %v1464_v18 = vunpack.i.h.bf16 %v1462_v16  ;;  %v1463_v19 = vunpack.i.l.bf16 %v1462_v16 }
 0x430   :  { %v1371_v20 = vpack.c.bf16 %v1464_v18, %v1463_v19 }
 0x431   :  { %v433_v25 = vpop.permute.xlu1 %432 }
 0x434   :  { %v1481_v3 = vpop.eup %1480 }
 0x435   :  { %v339_v4 = vsel %vm137_vm3, %v1481_v3, 0.0 }
 0x436   :  { %340 = vadd.xlane.f32.xlu0 %v339_v4 }
 0x44c   :  { %1451 = vrot.lane.b32.xlu0 %v1631_v41, %s1527_s18 }
 0x450   :  { %1466 = vrot.lane.b32.xlu0 %v1643_v51, %s1528_s19 }
 0x4c3   :  { %v341_v5 = vpop.xlane.xlu0 %340 }
 0x4c4   :  { %1482 = vrcp.f32 %v341_v5 }
 0x4c7   :  { %v1452_v7 = vpop.permute.xlu0 %1451 }
 0x4c8   :  { %v1454_v9 = vunpack.i.h.bf16 %v1452_v7  ;;  %v1453_v10 = vunpack.i.l.bf16 %v1452_v7 }
 0x4ca   :  { %v1365_v13 = vpack.c.bf16 %v1454_v9, %v1453_v10 }
 0x4cb   :  { %v1467_v21 = vpop.permute.xlu0 %1466 }
 0x4cc   :  { %1366 = vmatpush3.bf16.msra.mxu0 %v1365_v13  ;;  %v1469_v22 = vunpack.i.h.bf16 %v1467_v21  ;;  %v1468_v23 = vunpack.i.l.bf16 %v1467_v21 }
 0x4cd   :  { %1367 = vmatprep.subr.bf16.mxu0 %v1522_v1 }
 0x4ce   :  { %v1483_v14 = vpop.eup %1482  ;;  %v1375_v24 = vpack.c.bf16 %v1469_v22, %v1468_v23  ;;  %v806_v23 = vld [vmem:[#allocation4 + $0x78] sm:$0xff] }
 0x4cf   :  { %v1664_v17 = vmul.f32 %v1483_v14, %v1481_v3  ;;  %v770_v3 = vrot.slane %v1624_v35, %v769_v63 }
 0x4d0   :  { %1369 = vmatpush3.bf16.msra.mxu0 %v1368_v15 }
 0x4d1   :  { %1370 = vmatprep.subr.bf16.mxu0 %v1522_v1 }
 0x4d3   :  { %1244 = vmatmul.mubr.msk.f32.vlgmr.msra.gmra.mrb[6].mxu0 %vm137_vm3, %v1664_v17 }
 0x4d4   :  { %1254 = vmatprep.mubr.msk.f32.mxu0 %vm1523_vm0, %v1524_v8 }
 0x4d9   :  { %1373 = vmatpush3.bf16.xpose.msk.msra.mxu0 %vm1636_vm5, %v1371_v20 }
 0x4da   :  { %1374 = vmatprep.subr.bf16.mxu0 %v1522_v1 }
 0x4e1   :  { %1377 = vmatpush3.bf16.xpose.msk.msra.mxu0 %vm1636_vm5, %v1375_v24  ;;  %v807_v24 = vld [vmem:[#allocation4 + $0x80] sm:$0xff] }
 0x4e2   :  { %1390 = vmatprep.subr.bf16.mxu0 %v1522_v1 }
 0x4e8   :  { %1255 = vmatmul.mubr.msk.f32.vlgmr.msra.gmra.mrb[8].mxu0 %vm252_vm4, %v433_v25  ;;  %v1391_v25 = vpack.c.bf16 %v807_v24, %v806_v23  ;;  %v1003_v24 = vld [vmem:[#allocation4 + $0x118] sm:$0xff] }
 0x4e9   :  { %1290 = vmatprep.mubr.msk.f32.mxu0 %vm1523_vm0, %v1524_v8 }
 0x4ea   :  { %1392 = vmatpush3.bf16.msra.mxu0 %v1391_v25  ;;  %v1004_v25 = vld [vmem:[#allocation4 + $0x120] sm:$0xff] }
 0x4eb   :  { %1393 = vmatprep.subr.bf16.mxu0 %v1522_v1 }
 0x5a6   :  { %v426_v26 = vpop.f32.mrb[6].mxu0 }
 0x5a7   :  { %v1245_v30 = vpop.f32.mrb[7].mxu0 }
 0x5bb   :  { %v518_v33 = vpop.f32.mrb[8].mxu0 }
 0x5bc   :  { %v519_v36 = vadd.f32 %v518_v33, %v239_v58  ;;  %v1256_v37 = vpop.f32.mrb[9].mxu0  ;;  %v888_v33 = vld [vmem:[#allocation4 + $0x98] sm:$0xff] }
 0x5bd   :  { %v890_v37 = vld [vmem:[#allocation4 + $0xa8] sm:$0xff] }
 0x5be   :  { %v522_v38 = vsel %vm137_vm3, %v519_v36, -inf }
 0x5bf   :  { %523 = vmax.xlane.f32.xlu0 %v522_v38 }
 0x5d5   :  { %1471 = vrot.lane.b32.xlu0 %v1631_v41, %s1530_s20 }
 0x64c   :  { %v524_v39 = vpop.xlane.xlu0 %523 }
 0x64d   :  { %v525_v40 = vsub.f32 %v519_v36, %v524_v39  ;;  %v889_v36 = vld [vmem:[#allocation4 + $0xa0] sm:$0xff]  ;;  %v891_v39 = vld [vmem:[#allocation4 + $0xb0] sm:$0xff] }
 0x64e   :  { %v1397_v38 = vpack.c.bf16 %v889_v36, %v888_v33 }
 0x64f   :  { %v526_v42 = vmul.f32 1.442695, %v525_v40  ;;  %v1400_v40 = vpack.c.bf16 %v891_v39, %v890_v37  ;;  %v995_v39 = vsub.s32 6, %v1602_v27 }
 0x650   :  { %v1472_v43 = vpop.permute.xlu0 %1471 }
 0x651   :  { %1484 = vpow2.f32 %v526_v42  ;;  %v1474_v44 = vunpack.i.h.bf16 %v1472_v43  ;;  %v1473_v45 = vunpack.i.l.bf16 %v1472_v43  ;;  %v892_v42 = vld [vmem:[#allocation4 + $0xb8] sm:$0xff]  ;;  %v893_v43 = vld [vmem:[#allocation4 + $0xc0] sm:$0xff] }
 0x653   :  { %v1379_v46 = vpack.c.bf16 %v1474_v44, %v1473_v45  ;;  %v1403_v44 = vpack.c.bf16 %v893_v43, %v892_v42  ;;  %v894_v45 = vld [vmem:[#allocation4 + $0xc8] sm:$0xff]  ;;  %v996_v42 = vrot.slane %v1624_v35, %v995_v39 }
 0x655   :  { %1380 = vmatpush3.bf16.msra.mxu1 %v1379_v46  ;;  %v895_v46 = vld [vmem:[#allocation4 + $0xd0] sm:$0xff] }
 0x656   :  { %1381 = vmatprep.subr.bf16.mxu1 %v1522_v1 }
 0x65b   :  { %v1485_v47 = vpop.eup %1484 }
 0x65c   :  { %v528_v48 = vsel %vm137_vm3, %v1485_v47, 0.0 }
 0x65d   :  { %529 = vadd.xlane.f32.xlu1 %v528_v48  ;;  %v896_v48 = vld [vmem:[#allocation4 + $0xd8] sm:$0xff] }
 0x66e   :  { %1476 = vrot.lane.b32.xlu1 %v1643_v51, %s1530_s20  ;;  %v430_v51 = vld [vmem:[#allocation4 + $0x58] sm:$0xff] }
 0x66f   :  { %v1388_v60 = vpack.c.bf16 %v431_v59, %v430_v51  ;;  %v803_v59 = vsub.s32 3, %v1602_v27 }
 0x6ea   :  { %v530_v49 = vpop.xlane.xlu1 %529 }
 0x6eb   :  { %1486 = vrcp.f32 %v530_v49  ;;  %v897_v49 = vld [vmem:[#allocation4 + $0xe0] sm:$0xff] }
 0x6ee   :  { %v1477_v41 = vpop.permute.xlu1 %1476 }
 0x6ef   :  { %v1479_v50 = vunpack.i.h.bf16 %v1477_v41  ;;  %v1478_v52 = vunpack.i.l.bf16 %v1477_v41  ;;  %v1409_v41 = vpack.c.bf16 %v897_v49, %v896_v48  ;;  %v1010_v48 = vrot.slane %v1608_v29, %v135_v34 }
 0x6f0   :  { %v1093_v49 = vrot.slane %v1608_v29, %v769_v63 }
 0x6f1   :  { %v1382_v53 = vpack.c.bf16 %v1479_v50, %v1478_v52  ;;  %v898_v50 = vld [vmem:[#allocation4 + $0xe8] sm:$0xff]  ;;  %v899_v52 = vld [vmem:[#allocation4 + $0xf0] sm:$0xff] }
 0x6f3   :  { %1383 = vmatpush3.bf16.msra.mxu1 %v1382_v53  ;;  %v1412_v53 = vpack.c.bf16 %v899_v52, %v898_v50 }
 0x6f4   :  { %1384 = vmatprep.subr.bf16.mxu1 %v1522_v1 }
 0x6f5   :  { %v1487_v56 = vpop.eup %1486 }
 0x6f6   :  { %v532_v58 = vmul.f32 %v1487_v56, %v1485_v47  ;;  %v1406_v47 = vpack.c.bf16 %v895_v46, %v894_v45  ;;  %v1415_v56 = vpack.c.bf16 %v901_v55, %v900_v54 }
 0x6f8   :  { %1266 = vmatmul.mubr.msk.f32.vlgmr.msra.gmra.mrb[2].mxu1 %vm137_vm3, %v532_v58  ;;  %v533_v11 = vadd.f32 %v532_v58, %v1664_v17  ;;  %v808_v17 = vld [vmem:[#allocation4 + $0x88] sm:$0xff] }
 0x6f9   :  { %1386 = vmatpush3.bf16.msra.mxu1 %v1385_v57  ;;  %1272 = vmatprep.mubr.msk.f32.mxu1 %vm1523_vm0, %v1524_v8 }
 0x6fa   :  { %1387 = vmatprep.subr.bf16.mxu1 %v1522_v1  ;;  %v772_v12 = vmul.f32 0.5, %v533_v11 }
 0x6fc   :  { %v773_v13 = vadd.f32 1e-10, %v772_v12 }
 0x6fe   :  { %1488 = vlog2.f32 %v773_v13  ;;  %v976_v13 = vsub.s32 5, %v1602_v27 }
 0x708   :  { %v1489_v14 = vpop.eup %1488 }
 0x709   :  { %v775_v19 = vmul.f32 0.6931472, %v1489_v14  ;;  %v977_v14 = vrot.slane %v1624_v35, %v976_v13 }
 0x70b   :  { %v776_v22 = vmul.f32 %v775_v19, %v772_v12 }
 0x7cb   :  { %v615_v61 = vpop.f32.mrb[2].mxu1 }
 0x7cc   :  { %v1267_v62 = vpop.f32.mrb[3].mxu1  ;;  %1273 = vmatmul.mubr.msk.f32.vlgmr.msra.gmra.mrb[4].mxu1 %vm252_vm4, %v615_v61 }
 0x7cd   :  { %1389 = vmatpush3.bf16.msra.mxu1 %v1388_v60  ;;  %1279 = vmatprep.mubr.msk.f32.mxu1 %vm1523_vm0, %v1524_v8  ;;  %v799_v60 = vrot.slane %v1624_v35, %v798_v28 }
 0x7ce   :  { %1396 = vmatprep.subr.bf16.mxu1 %v1522_v1 }
 0x7d0   :  { %1280 = vmatmul.mubr.msk.f32.vlgmr.msra.gmra.mrb[6].mxu1 %vm252_vm4, %v426_v26  ;;  %v809_v26 = vld [vmem:[#allocation4 + $0x90] sm:$0xff] }
 0x7d1   :  { %1325 = vmatprep.mubr.msk.f32.mxu1 %vm1523_vm0, %v1524_v8  ;;  %v1394_v30 = vpack.c.bf16 %v809_v26, %v808_v17  ;;  %1398 = vmatpush3.bf16.msra.mxu1 %v1397_v38  ;;  %v1421_v17 = vpack.c.bf16 %v1004_v25, %v1003_v24  ;;  %v1005_v26 = vld [vmem:[#allocation4 + $0x128] sm:$0xff] }
 0x7d2   :  { %1399 = vmatprep.subr.bf16.mxu1 %v1522_v1 }
 0x7d3   :  { %1395 = vmatpush3.bf16.msra.mxu0 %v1394_v30  ;;  %v1006_v30 = vld [vmem:[#allocation4 + $0x130] sm:$0xff] }
 0x7d4   :  { %1420 = vmatprep.subr.bf16.mxu0 %v1522_v1  ;;  %v1424_v33 = vpack.c.bf16 %v1006_v30, %v1005_v26 }
 0x7d5   :  { %1401 = vmatpush3.bf16.msra.mxu1 %v1400_v40  ;;  %v1000_v40 = vsub.s32 7, %v1602_v27 }
 0x7d6   :  { %1402 = vmatprep.subr.bf16.mxu1 %v1522_v1 }
 0x7d7   :  { %v1001_v45 = vrot.slane %v1624_v35, %v1000_v40 }
 0x7d9   :  { %1404 = vmatpush3.bf16.msra.mxu1 %v1403_v44 }
 0x7da   :  { %1405 = vmatprep.subr.bf16.mxu1 %v1522_v1 }
 0x7dd   :  { %1407 = vmatpush3.bf16.msra.mxu1 %v1406_v47 }
 0x7de   :  { %1408 = vmatprep.subr.bf16.mxu1 %v1522_v1 }
 0x7e1   :  { %1410 = vmatpush3.bf16.msra.mxu1 %v1409_v41 }
 0x7e2   :  { %1411 = vmatprep.subr.bf16.mxu1 %v1522_v1 }
 0x7e5   :  { %1413 = vmatpush3.bf16.msra.mxu1 %v1412_v53 }
 0x7e6   :  { %1414 = vmatprep.subr.bf16.mxu1 %v1522_v1 }
 0x7e9   :  { %1416 = vmatpush3.bf16.msra.mxu1 %v1415_v56 }
 0x7ea   :  { %1417 = vmatprep.subr.bf16.mxu1 %v1522_v1 }
 0x89f   :  { %v690_v0 = vpop.f32.mrb[4].mxu1 }
 0x8a0   :  { %v1274_v2 = vpop.f32.mrb[5].mxu1 }
 0x8a3   :  { %v763_v4 = vpop.f32.mrb[6].mxu1 }
 0x8a4   :  { %v764_v5 = vadd.f32 %v763_v4, %v690_v0  ;;  %v1281_v6 = vpop.f32.mrb[7].mxu1  ;;  %v804_v0 = vrot.slane %v1624_v35, %v803_v59  ;;  %v902_v4 = vld [vmem:[#allocation4 + $0x108] sm:$0xff] }
 0x8a6   :  { %v771_v7 = vadd.f32 %v770_v3, %v764_v5  ;;  %v903_v5 = vld [vmem:[#allocation4 + $0x110] sm:$0xff] }
 0x8a7   :  { %v1418_v6 = vpack.c.bf16 %v903_v5, %v902_v4 }
 0x8a8   :  { %v781_v9 = vadd.f32 %v771_v7, %v1613_v31  ;;  %v777_v31 = vsel %vm137_vm3, %v776_v22, 0.0  ;;  %v812_v7 = vsub.s32 4, %v1602_v27 }
 0x8a9   :  { %1419 = vmatpush3.bf16.msra.mxu1 %v1418_v6 }
 0x8aa   :  { %v782_v10 = vsel %vm137_vm3, %v781_v9, 0.0 }
 0x8ab   :  { %783 = vadd.xlane.f32.xlu0 %v782_v10 }
 0x938   :  { %v784_v15 = vpop.xlane.xlu0 %783 }
 0x939   :  { %v786_v16 = vmul.f32 0.03125, %v784_v15 }
 0x93b   :  { %v787_v18 = vsub.f32 %v781_v9, %v786_v16  ;;  %v813_v9 = vrot.slane %v1624_v35, %v812_v7 }
 0x93d   :  { %v788_v20 = vmul.f32 %v787_v18, %v787_v18 }
 0x93f   :  { %v789_v21 = vsel %vm137_vm3, %v788_v20, 0.0 }
 0x940   :  { %790 = vadd.xlane.f32.xlu1 %v789_v21 }
 0x944   :  { %778 = vadd.xlane.f32.xlu1 %v777_v31 }
 0x9cd   :  { %v791_v57 = vpop.xlane.xlu1 %790 }
 0x9ce   :  { %v792_v58 = vmul.f32 0.03125, %v791_v57 }
 0x9d0   :  { %v793_v51 = vadd.f32 1e-05, %v792_v58 }
 0x9d1   :  { %v779_v47 = vpop.xlane.xlu1 %778 }
 0x9d2   :  { %1490 = vrsqrt.f32 %v793_v51  ;;  %v780_v41 = vsub.f32 0.0, %v779_v47 }
 0x9d4   :  { %v1094_v54 = vmul.f32 %v1093_v49, %v780_v41 }
 0x9dc   :  { %v1491_v61 = vpop.eup %1490 }
 0x9dd   :  { %v795_v62 = vmul.f32 %v1491_v61, %v787_v18 }
 0x9df   :  { %v800_v2 = vmul.f32 %v799_v60, %v795_v62 }
 0x9e1   :  { %v805_v3 = vadd.f32 %v804_v0, %v800_v2 }
 0x9e3   :  { %1291 = vmatmul.mubr.msk.f32.vlgmr.msra.gmra.mrb[10].mxu0 %vm137_vm3, %v805_v3 }
 0x9e4   :  { %1336 = vmatprep.mubr.msk.f32.mxu0 %vm1523_vm0, %v1524_v8  ;;  %1422 = vmatpush3.bf16.msra.mxu0 %v1421_v17 }
 0x9e5   :  { %1423 = vmatprep.subr.bf16.mxu0 %v1522_v1 }
 0x9e8   :  { %1425 = vmatpush3.bf16.msra.mxu0 %v1424_v33 }
 0xab6   :  { %v883_v28 = vpop.f32.mrb[10].mxu0 }
 0xab7   :  { %v884_v10 = vadd.f32 %v883_v28, %v813_v9  ;;  %v1292_v11 = vpop.f32.mrb[11].mxu0 }
 0xab9   :  { %v887_v12 = vmax.f32 %v884_v10, 0.0 }
 0xabb   :  { %1326 = vmatmul.mubr.f32.vlgmr.msra.gmra.mrb[8].mxu1 %v887_v12 }
 0xb8e   :  { %v970_v15 = vpop.f32.mrb[8].mxu1 }
 0xb8f   :  { %v978_v16 = vadd.f32 %v977_v14, %v970_v15  ;;  %v1327_v8 = vpop.f32.mrb[9].mxu1 }
 0xb91   :  { %v979_v18 = vadd.f32 %v978_v16, %v805_v3 }
 0xb93   :  { %v980_v19 = vsel %vm137_vm3, %v979_v18, 0.0 }
 0xb94   :  { %981 = vadd.xlane.f32.xlu0 %v980_v19 }
 0xc21   :  { %v982_v20 = vpop.xlane.xlu0 %981 }
 0xc22   :  { %v983_v21 = vmul.f32 0.03125, %v982_v20 }
 0xc24   :  { %v984_v22 = vsub.f32 %v979_v18, %v983_v21 }
 0xc26   :  { %v985_v31 = vmul.f32 %v984_v22, %v984_v22 }
 0xc28   :  { %v986_v23 = vsel %vm137_vm3, %v985_v31, 0.0 }
 0xc29   :  { %987 = vadd.xlane.f32.xlu0 %v986_v23 }
 0xcb6   :  { %v988_v36 = vpop.xlane.xlu0 %987 }
 0xcb7   :  { %v989_v37 = vmul.f32 0.03125, %v988_v36 }
 0xcb9   :  { %v990_v38 = vadd.f32 1e-05, %v989_v37 }
 0xcbb   :  { %1492 = vrsqrt.f32 %v990_v38 }
 0xcc5   :  { %v1493_v43 = vpop.eup %1492 }
 0xcc6   :  { %v992_v44 = vmul.f32 %v1493_v43, %v984_v22 }
 0xcc8   :  { %v997_v46 = vmul.f32 %v996_v42, %v992_v44 }
 0xcca   :  { %v1002_v1 = vadd.f32 %v1001_v45, %v997_v46 }
 0xccc   :  { %1337 = vmatmul.mubr.msk.f32.vlgmr.msra.gmra.mrb[12].mxu0 %vm137_vm3, %v1002_v1 }
 0xd9f   :  { %v1080_v50 = vpop.f32.mrb[12].mxu0 }
 0xda0   :  { %v1081_v52 = vadd.f32 %v1080_v50, %v1010_v48  ;;  %v1338_v53 = vpop.f32.mrb[13].mxu0 }
 0xda2   :  { %v1089_v35 = vadd.f32 %v1616_v32, %v1081_v52 }
 0xda4   :  { %v1095_v55 = vadd.f32 %v1094_v54, %v1089_v35 }
 0xda6   :  { %1096 = vst [vmem:[%s1750_s5] sm:$0xff] %v1095_v55 }
 0xda7   :  { %1101 = vsyncpa [#allocation5], 1 }

</bundles_post_ra>
